<compile_context>
chip_gen: v5e
topology: v5e:2x2
jax: 0.10.0
libtpu: 0.0.40
codegen_flags: <defaults>
</compile_context>

<pallas_src>
import functools

import jax
import jax.numpy as jnp
from jax import lax
from jax.experimental import pallas as pl
from jax.experimental.pallas import tpu as pltpu


def _round_up(x, m):
    return ((x + m - 1) // m) * m


def _mmd_kernel(z_ref, o_ref, g_acc, *, m, n, gammas):
    """Accumulate Gram(Z) over D-tiles; on the last tile finish the MMD loss."""
    k = pl.program_id(0)

    @pl.when(k == 0)
    def _init():
        g_acc[...] = jnp.zeros_like(g_acc)

    # One MXU pass per D-tile: G += Z_tile @ Z_tile^T (f32 accumulation).
    z = z_ref[...]
    g_acc[...] += lax.dot_general(
        z, z,
        dimension_numbers=(((1,), (1,)), ((), ())),
        preferred_element_type=jnp.float32,
    )

    @pl.when(k == pl.num_programs(0) - 1)
    def _finalize():
        P = m + n
        G = g_acc[...]

        # Squared norms = diag(G), extracted as a column and a row (no transpose).
        rows = lax.broadcasted_iota(jnp.int32, (P, P), 0)
        cols = lax.broadcasted_iota(jnp.int32, (P, P), 1)
        diag_only = jnp.where(rows == cols, G, 0.0)
        sq_col = jnp.sum(diag_only, axis=1, keepdims=True)   # (P, 1)
        sq_row = jnp.sum(diag_only, axis=0, keepdims=True)   # (1, P)

        # Pairwise squared distances over the concatenated points.
        d = sq_col + sq_row - 2.0 * G                          # (P, P)

        # Biased MMD^2 = w^T K w with w_i = 1/m (Target rows), -1/n (Source rows).
        w_col = jnp.where(
            lax.broadcasted_iota(jnp.int32, (P, 1), 0) < m, 1.0 / m, -1.0 / n)
        w_row = jnp.where(
            lax.broadcasted_iota(jnp.int32, (1, P), 1) < m, 1.0 / m, -1.0 / n)
        W = w_col * w_row                                      # (P, P)

        mmd2 = jnp.float32(0.0)
        for g in gammas:  # static (small) sigma list -> unrolled; exp uses the EUP slot
            mmd2 = mmd2 + jnp.sum(W * jnp.exp(d * jnp.float32(-g)))

        # F.relu then torch.sqrt; scalar result written straight to SMEM.
        o_ref[0, 0] = jnp.sqrt(jnp.maximum(mmd2, 0.0))


def mmd_loss(target, source, base=1.0, sigma_list=(1.0, 2.0, 10.0)):
    """Pallas equivalent of MMDLoss(base, sigma_list)(Target, Source) -> scalar."""
    target = jnp.asarray(target)
    source = jnp.asarray(source)
    m = target.shape[0]
    n = source.shape[0]
    X = target.reshape(m, -1)
    Y = source.reshape(n, -1)
    D = X.shape[1]
    assert Y.shape[1] == D, "Target/Source feature dims must match"

    # One slab -> one Gram matrix (halves MXU passes and VMEM read traffic).
    Z = jnp.concatenate([X, Y], axis=0)
    P = m + n
    itemsize = Z.dtype.itemsize

    # Lane-aligned D-tile, >= 512 lanes when possible; shrink (staying a multiple of
    # 128) if the double-buffered input block would blow a conservative VMEM budget.
    tile_d = min(_round_up(D, 128), 512)
    while tile_d > 128 and 4 * P * tile_d * itemsize > 16 * 1024 * 1024:
        tile_d = max(128, _round_up(tile_d // 2, 128))
    d_pad = _round_up(D, tile_d)
    if d_pad != D:
        # Zero padding leaves dot products (hence the Gram matrix) unchanged.
        Z = jnp.pad(Z, ((0, 0), (0, d_pad - D)))
    num_d_tiles = d_pad // tile_d

    sigmas = [float(sig) / float(base) for sig in sigma_list]
    gammas = tuple(1.0 / (2.0 * sig ** 2) for sig in sigmas)

    kernel = functools.partial(_mmd_kernel, m=m, n=n, gammas=gammas)

    # VMEM budget: double-buffered (P, tile_d) input + (P, P) f32 Gram scratch (+slack).
    scratch_bytes = 4 * _round_up(P, 8) * _round_up(max(P, 1), 128)
    vmem_limit = int(
        min(100 * 1024 * 1024,
            max(32 * 1024 * 1024, 4 * P * tile_d * itemsize + 8 * scratch_bytes)))

    cost = pl.CostEstimate(
        flops=int(2 * P * P * d_pad + 6 * P * P * len(gammas)),
        transcendentals=int(len(gammas) * P * P),
        bytes_accessed=int(P * d_pad * itemsize + 4),
    )

    out = pl.pallas_call(
        kernel,
        out_shape=jax.ShapeDtypeStruct((1, 1), jnp.float32),
        grid_spec=pltpu.PrefetchScalarGridSpec(
            num_scalar_prefetch=0,
            grid=(num_d_tiles,),
            in_specs=[pl.BlockSpec((P, tile_d), lambda k: (0, k))],
            out_specs=pl.BlockSpec(memory_space=pltpu.MemorySpace.SMEM),
            scratch_shapes=[pltpu.VMEM((P, P), jnp.float32)],
        ),
        compiler_params=pltpu.CompilerParams(
            dimension_semantics=("arbitrary",),  # D is the reduction axis
            vmem_limit_bytes=vmem_limit,
        ),
        cost_estimate=cost,
    )(Z)
    return out[0, 0]


def _mmd_loss_ref(target, source, base=1.0, sigma_list=(1.0, 2.0, 10.0)):
    """Pure-JAX reference for correctness checking."""
    X = jnp.asarray(target, jnp.float32).reshape(target.shape[0], -1)
    Y = jnp.asarray(source, jnp.float32).reshape(source.shape[0], -1)
    m, n = X.shape[0], Y.shape[0]
    x_sq = jnp.sum(X * X, 1, keepdims=True)
    y_sq = jnp.sum(Y * Y, 1, keepdims=True)
    d_xx = x_sq + x_sq.T - 2.0 * (X @ X.T)
    d_yy = y_sq + y_sq.T - 2.0 * (Y @ Y.T)
    d_xy = x_sq + y_sq.T - 2.0 * (X @ Y.T)
    k_xx = k_yy = k_xy = 0.0
    for sig in [s_ / base for s_ in sigma_list]:
        g = 1.0 / (2.0 * sig ** 2)
        k_xx = k_xx + jnp.exp(-g * d_xx)
        k_yy = k_yy + jnp.exp(-g * d_yy)
        k_xy = k_xy + jnp.exp(-g * d_xy)
    mmd2 = k_xx.sum() / (m * m) + k_yy.sum() / (n * n) - 2.0 * k_xy.sum() / (m * n)
    return jnp.sqrt(jnp.maximum(mmd2, 0.0))


if __name__ == "__main__":
    key = jax.random.PRNGKey(0)
    k_t, k_s = jax.random.split(key)

    # Small NCHW inputs: batch=8, channels=4, spatial 16x16 -> D = 1024 (2 D-tiles of 512),
    # which exercises the multi-step Gram accumulation path.
    target = jax.random.normal(k_t, (8, 4, 16, 16), dtype=jnp.float32)
    source = 0.5 * jax.random.normal(k_s, (8, 4, 16, 16), dtype=jnp.float32) + 0.1

    out = jax.block_until_ready(mmd_loss(target, source))
    ref = jax.block_until_ready(_mmd_loss_ref(target, source))
    assert jnp.allclose(out, ref, rtol=1e-5, atol=1e-5), (out, ref)

    print("KERNEL_OK")
</pallas_src>

<mosaic_0001>
module attributes {stable_mosaic.version = 11 : i64} {
  func.func @_mmd_kernel(%arg0: i32, %arg1: memref<16x512xf32, #tpu.memory_space<vmem>>, %arg2: memref<1x1xf32, #tpu.memory_space<smem>>, %arg3: memref<16x16xf32, #tpu.memory_space<vmem>>) attributes {dimension_semantics = [#tpu.dimension_semantics<arbitrary>], iteration_bounds = array<i64: 2>, scalar_prefetch = 0 : i64, scratch_operands = 1 : i64, tpu.core_type = #tpu.core_type<tc>, window_params = [{transform_indices = @transform_0, window_bounds = array<i64: 16, 512>}, {transform_indices = @transform_1, window_bounds = array<i64: 1, 1>}]} {
    %c0_i32 = arith.constant 0 : i32
    %0 = arith.cmpi eq, %arg0, %c0_i32 : i32
    %1 = arith.extui %0 : i1 to i32
    %c0_i32_0 = arith.constant 0 : i32
    %2 = arith.cmpi ne, %1, %c0_i32_0 : i32
    scf.if %2 {
      %cst_7 = arith.constant 0.000000e+00 : f32
      %11 = vector.broadcast %cst_7 : f32 to vector<16x16xf32>
      %c0_8 = arith.constant 0 : index
      %c0_9 = arith.constant 0 : index
      %12 = vector.load %arg3[%c0_8, %c0_9] : memref<16x16xf32, #tpu.memory_space<vmem>>, vector<16x16xf32>
      tpu.vector_store %arg3[%c0_8, %c0_9], %11 {strides = array<i32>} : memref<16x16xf32, #tpu.memory_space<vmem>>, vector<16x16xf32>,
    } else {
    }
    %c0 = arith.constant 0 : index
    %c0_1 = arith.constant 0 : index
    %3 = vector.load %arg1[%c0, %c0_1] : memref<16x512xf32, #tpu.memory_space<vmem>>, vector<16x512xf32>
    %c0_2 = arith.constant 0 : index
    %c0_3 = arith.constant 0 : index
    %4 = vector.load %arg3[%c0_2, %c0_3] : memref<16x16xf32, #tpu.memory_space<vmem>>, vector<16x16xf32>
    %cst = arith.constant dense<0.000000e+00> : vector<16x16xf32>
    %5 = tpu.matmul %3, %3, %cst {dimension_numbers = #tpu.dot_dimension_numbers<[1], [1], [0], [0], [0, 0, 1, 0], [], []>} : vector<16x512xf32>, vector<16x512xf32>, vector<16x16xf32> -> vector<16x16xf32>
    %6 = arith.addf %4, %5 : vector<16x16xf32>
    %c0_4 = arith.constant 0 : index
    %c0_5 = arith.constant 0 : index
    %7 = vector.load %arg3[%c0_4, %c0_5] : memref<16x16xf32, #tpu.memory_space<vmem>>, vector<16x16xf32>
    tpu.vector_store %arg3[%c0_4, %c0_5], %6 {strides = array<i32>} : memref<16x16xf32, #tpu.memory_space<vmem>>, vector<16x16xf32>,
    %c1_i32 = arith.constant 1 : i32
    %8 = arith.cmpi eq, %arg0, %c1_i32 : i32
    %9 = arith.extui %8 : i1 to i32
    %c0_i32_6 = arith.constant 0 : i32
    %10 = arith.cmpi ne, %9, %c0_i32_6 : i32
    scf.if %10 {
      %c0_7 = arith.constant 0 : index
      %c0_8 = arith.constant 0 : index
      %11 = vector.load %arg3[%c0_7, %c0_8] : memref<16x16xf32, #tpu.memory_space<vmem>>, vector<16x16xf32>
      %12 = tpu.iota {dimensions = array<i32: 0>} : vector<16x16xi32>
      %13 = tpu.iota {dimensions = array<i32: 1>} : vector<16x16xi32>
      %14 = arith.cmpi eq, %12, %13 : vector<16x16xi32>
      %cst_9 = arith.constant 0.000000e+00 : f32
      %15 = vector.broadcast %cst_9 : f32 to vector<16x16xf32>
      %16 = arith.select %14, %11, %15 : vector<16x16xi1>, vector<16x16xf32>
      %cst_10 = arith.constant dense<0.000000e+00> : vector<16xf32>
      %17 = vector.multi_reduction <add>, %16, %cst_10 [1] : vector<16x16xf32> to vector<16xf32>
      %18 = vector.shape_cast %17 : vector<16xf32> to vector<16x1xf32>
      %cst_11 = arith.constant dense<0.000000e+00> : vector<16xf32>
      %19 = vector.multi_reduction <add>, %16, %cst_11 [0] : vector<16x16xf32> to vector<16xf32>
      %20 = vector.shape_cast %19 : vector<16xf32> to vector<1x16xf32>
      %21 = vector.broadcast %18 : vector<16x1xf32> to vector<16x16xf32>
      %22 = vector.broadcast %20 : vector<1x16xf32> to vector<16x16xf32>
      %23 = arith.addf %21, %22 : vector<16x16xf32>
      %cst_12 = arith.constant 2.000000e+00 : f32
      %24 = vector.broadcast %cst_12 : f32 to vector<16x16xf32>
      %25 = arith.mulf %24, %11 : vector<16x16xf32>
      %26 = arith.subf %23, %25 : vector<16x16xf32>
      %27 = tpu.iota {dimensions = array<i32: 0>} : vector<16x1xi32>
      %c8_i32 = arith.constant 8 : i32
      %28 = vector.broadcast %c8_i32 : i32 to vector<16x1xi32>
      %29 = arith.cmpi slt, %27, %28 : vector<16x1xi32>
      %cst_13 = arith.constant 1.250000e-01 : f32
      %cst_14 = arith.constant -1.250000e-01 : f32
      %30 = vector.broadcast %cst_13 : f32 to vector<16x1xf32>
      %31 = vector.broadcast %cst_14 : f32 to vector<16x1xf32>
      %32 = arith.select %29, %30, %31 : vector<16x1xi1>, vector<16x1xf32>
      %33 = tpu.iota {dimensions = array<i32: 1>} : vector<1x16xi32>
      %c8_i32_15 = arith.constant 8 : i32
      %34 = vector.broadcast %c8_i32_15 : i32 to vector<1x16xi32>
      %35 = arith.cmpi slt, %33, %34 : vector<1x16xi32>
      %cst_16 = arith.constant 1.250000e-01 : f32
      %cst_17 = arith.constant -1.250000e-01 : f32
      %36 = vector.broadcast %cst_16 : f32 to vector<1x16xf32>
      %37 = vector.broadcast %cst_17 : f32 to vector<1x16xf32>
      %38 = arith.select %35, %36, %37 : vector<1x16xi1>, vector<1x16xf32>
      %39 = vector.broadcast %32 : vector<16x1xf32> to vector<16x16xf32>
      %40 = vector.broadcast %38 : vector<1x16xf32> to vector<16x16xf32>
      %41 = arith.mulf %39, %40 : vector<16x16xf32>
      %cst_18 = arith.constant -5.000000e-01 : f32
      %42 = vector.broadcast %cst_18 : f32 to vector<16x16xf32>
      %43 = arith.mulf %26, %42 : vector<16x16xf32>
      %44 = math.exp %43 : vector<16x16xf32>
      %45 = arith.mulf %41, %44 : vector<16x16xf32>
      %46 = vector.shape_cast %45 : vector<16x16xf32> to vector<1x16x16xf32>
      %cst_19 = arith.constant dense<0.000000e+00> : vector<1xf32>
      %47 = vector.multi_reduction <add>, %46, %cst_19 [1, 2] : vector<1x16x16xf32> to vector<1xf32>
      %48 = vector.shape_cast %47 : vector<1xf32> to vector<1x1x1xf32>
      %49 = vector.extract %48[0, 0, 0] : f32 from vector<1x1x1xf32>
      %cst_20 = arith.constant 0.000000e+00 : f32
      %50 = arith.addf %cst_20, %49 : f32
      %cst_21 = arith.constant -1.250000e-01 : f32
      %51 = vector.broadcast %cst_21 : f32 to vector<16x16xf32>
      %52 = arith.mulf %26, %51 : vector<16x16xf32>
      %53 = math.exp %52 : vector<16x16xf32>
      %54 = arith.mulf %41, %53 : vector<16x16xf32>
      %55 = vector.shape_cast %54 : vector<16x16xf32> to vector<1x16x16xf32>
      %cst_22 = arith.constant dense<0.000000e+00> : vector<1xf32>
      %56 = vector.multi_reduction <add>, %55, %cst_22 [1, 2] : vector<1x16x16xf32> to vector<1xf32>
      %57 = vector.shape_cast %56 : vector<1xf32> to vector<1x1x1xf32>
      %58 = vector.extract %57[0, 0, 0] : f32 from vector<1x1x1xf32>
      %59 = arith.addf %50, %58 : f32
      %cst_23 = arith.constant -5.000000e-03 : f32
      %60 = vector.broadcast %cst_23 : f32 to vector<16x16xf32>
      %61 = arith.mulf %26, %60 : vector<16x16xf32>
      %62 = math.exp %61 : vector<16x16xf32>
      %63 = arith.mulf %41, %62 : vector<16x16xf32>
      %64 = vector.shape_cast %63 : vector<16x16xf32> to vector<1x16x16xf32>
      %cst_24 = arith.constant dense<0.000000e+00> : vector<1xf32>
      %65 = vector.multi_reduction <add>, %64, %cst_24 [1, 2] : vector<1x16x16xf32> to vector<1xf32>
      %66 = vector.shape_cast %65 : vector<1xf32> to vector<1x1x1xf32>
      %67 = vector.extract %66[0, 0, 0] : f32 from vector<1x1x1xf32>
      %68 = arith.addf %59, %67 : f32
      %cst_25 = arith.constant 0.000000e+00 : f32
      %69 = arith.maximumf %68, %cst_25 : f32
      %70 = math.sqrt %69 : f32
      %c0_26 = arith.constant 0 : index
      %c0_27 = arith.constant 0 : index
      %71 = memref.load %arg2[%c0_26, %c0_27] : memref<1x1xf32, #tpu.memory_space<smem>>
      memref.store %70, %arg2[%c0_26, %c0_27] : memref<1x1xf32, #tpu.memory_space<smem>>
    } else {
    }
    return
  }
  func.func @transform_0(%arg0: i32) -> (i32, i32) {
    %c0_i32 = arith.constant 0 : i32
    %c0_i32_0 = arith.constant 0 : i32
    return %c0_i32, %arg0 : i32, i32
  }
  func.func @transform_1(%arg0: i32) -> (i32, i32) {
    %c0_i32 = arith.constant 0 : i32
    %c0_i32_0 = arith.constant 0 : i32
    %c0_i32_1 = arith.constant 0 : i32
    return %c0_i32, %c0_i32_0 : i32, i32
  }
}

</mosaic_0001>

<bundles_post_ra>
// kernel: tpu_custom_call.1
= control target key start
LH: loop header
LB: loop body
LE: loop exit
PB: predicated region body
PF: predicated region fallthrough
CT: control target
= control target key end

     0   :  { %6 = vsyncpa [#allocation4], 0  ;;  %s711_s0 = inlined_call_operand.hbm [shape: f32[16,1024], index: 0, kind: input, shape index: {}]   ;;  %s712_s1 = inlined_call_operand.hbm [shape: f32[1,1], index: 1, kind: output, shape index: {}]  }
   0x1   :  { %8 = vsyncpa [#allocation4 + $0x1], 0 }
   0x2   :  { %9 = vsyncpa [#allocation5], 0  ;;  %s610_s6 = smov 0   ;;  %s612_s7 = smov 0  }
   0x3   :  { %s614_s8 = smov 0   ;;  %s616_s9 = smov 0  }
   0x4 LB: > { %s629_s10 = sadd.s32 4294967295, %s591_s9   ;;  %s632_s11 = sadd.s32 1, %s591_s9   ;;  %s591_s9 = sphi %s616_s9, %s719_s9   ;;  %s587_s8 = sphi %s614_s8, %s718_s8   ;;  %s583_s7 = sphi %s612_s7, %s717_s7   ;;  %s579_s6 = sphi %s610_s6, %s716_s6  }
   0x5   : > { %s19_s12 = ssub.s32 %s591_s9, %s632_s11  ;;  %s22_s13 = sadd.s32 1, %s587_s8 }
   0x6   : > { %p20_p0 = scmp.eq.s32.totalorder %s19_s12, 0  ;;  %p29_p1 = scmp.ne.s32.totalorder %s587_s8, %s583_s7 }
   0x7   : > { %p30_p2 = scmp.eq.s32.totalorder %s591_s9, 0  ;;  %p35_p3 = scmp.ne.s32.totalorder %s583_s7, %s579_s6 }
   0x8   : > { %s642_s14 = scalar_select %p20_p0, %s587_s8, %s22_s13  }
   0x9   : > { %p644_p4 = por %p30_p2, %p29_p1  ;;  %p36_p5 = scmp.eq.s32.totalorder %s629_s10, 0 }
   0xa   : > { %p453_p6 = scmp.lt.s32.totalorder %s591_s9, 2  ;;  %s80_s17 = sand.u32 1, %s587_s8  }
   0xb   : > { %p650_p7 = por %p36_p5, %p35_p3  ;;  %s423_s18 = sshll.u32 %s80_s17, 6 }
   0xc   : > { %s434_s19 = sshll.u32 %s591_s9, 5  ;;  %s84_s23 = scalar_lea.vmem [#allocation3], %s423_s18 }
   0xd   : > { %s89_s22 = scalar_lea.hbm %s711_s0, %s434_s19  ;;  %s92_s24 = sshll.u32 %s84_s23, 4  ;;  %s93_s24 = int_to_ptr.vmem [resolvable:$true] %s92_s24 }
   0xe   : > { %s90_s25 = sshll.u32 %s89_s22, 4  ;;  %p661_p8 = pnand %p453_p6, %p644_p4  ;;  %s91_s25 = int_to_ptr.hbm [resolvable:$true] %s90_s25 }
   0xf   : > { %s81_s27 = scalar_lea.sflag [#allocation4], %s80_s17  ;;  %s509_s28 = sshra.s32 %s91_s25, 4  ;;  %s510_s28 = int_to_ptr.hbm [resolvable:$true] %s509_s28 }
  0x10   : > { %s511_s29 = scalar_lea.hbm %s510_s28, 64  ;;  %p513_p10 = pneg %p661_p8 }
  0x11   : > { %p512_p9 = scmp.ne.s32.totalorder %s510_s28, %s511_s29  ;;  %s516_s3 = scalar_lea.hbm %s711_s0, 128 }
  0x12   : > { %p517_p13 = scmp.lt.s32.totalorder %s510_s28, %s711_s0  ;;  %p518_p0 = scmp.lt.s32.totalorder %s516_s3, %s511_s29 }
  0x13   : > { %p514_p11 = pnand %p513_p10, %p512_p9 }
  0x14   : > { %p519_p1 = por %p518_p0, %p517_p13 }
  0x15   : > { %p515_p12 = pneg %p514_p11 }
  0x17   : > { %p520_p2 = pnand %p519_p1, %p515_p12 }
  0x19   : > { %523 = shalt.err (!%p520_p2)
}
  0x1a   : > { %s593_s6 = smov 1024   ;;  %s594_s12 = smov 512  }
  0x1b   : > { %s595_s13 = smov 32   ;;  %p426_p3 = scmp.ge.s32.totalorder %s591_s9, 1 }
  0x1c   : > { %452 = dma.hbm_to_vmem [thread:$0]  (!%p661_p8), %s91_s25, 1024, %s93_s24, %s81_s27, %s593_s6, %s594_s12, %s595_s13  }
  0x1d   : > { %p100_p4 = scmp.lt.s32.totalorder %s591_s9, 3 }
  0x1f   : > { %p101_p5 = pnand %p426_p3, %p100_p4 }
  0x20   : > { %s106_s15 = sand.u32 (!%p101_p5), 1, %s583_s7  }
  0x21   : > { %104 = sbr.rel (%p101_p5) target bundleno = 625 (0x271), region = 24  ;;  %s427_s17 = sshll.u32 (!%p101_p5), %s106_s15, 6 }
  0x22   : > { %s107_s18 = scalar_lea.sflag (!%p101_p5), [#allocation4], %s106_s15  ;;  %s110_s19 = scalar_lea.vmem (!%p101_p5), [#allocation3], %s427_s17 }
  0x26   : > { %570 = dma.done.wait (%p650_p7), %s107_s18, 1024  }
  0x27   : > { %572 = vsyncadd (%p650_p7), %s107_s18, 4294966272  ;;  %p428_p6 = scmp.ne.s32.totalorder %s629_s10, 0 }
  0x29   : > { %129 = sbr.rel (%p428_p6) target bundleno = 49 (0x31), region = 32 }
  0x2e   : > { %vm130_vm0 = vcmask 130048   ;;  %v596_v0 = vmov 0.0  }
  0x2f   : > { %131 = vst.msk [vmem:[#allocation2] sm:$0xff] %vm130_vm0, %v596_v0 }
  0x30   : > { %132 = vst.msk [vmem:[#allocation2 + $0x8] sm:$0xff] %vm130_vm0, %v596_v0 }
  0x31 PF: > { %v139_v1 = vld [vmem:[%s110_s19 + $0x30] sm:$0xff]  ;;  %v140_v2 = vld [vmem:[%s110_s19 + $0x38] sm:$0xff]  ;;  %v137_v3 = vld [vmem:[%s110_s19 + $0x20] sm:$0xff]  ;;  %vm237_vm1 = vcmask 130048   ;;  %p429_p7 = scmp.ne.s32.totalorder %s629_s10, 1 }
  0x32   : > { %203 = vmatpush.xpose.msra.mxu2 %v139_v1  ;;  %226 = vmatpush.xpose.msra.mxu3 %v140_v2  ;;  %v138_v4 = vld [vmem:[%s110_s19 + $0x28] sm:$0xff]  ;;  %v135_v5 = vld [vmem:[%s110_s19 + $0x10] sm:$0xff]  ;;  %v136_v6 = vld [vmem:[%s110_s19 + $0x18] sm:$0xff]  ;;  %s598_s23 = smov (!%p429_p7), 0.0  }
  0x33   : > { %157 = vmatpush.xpose.msra.mxu0 %v137_v3  ;;  %180 = vmatpush.xpose.msra.mxu1 %v138_v4  ;;  %v133_v7 = vld [vmem:[%s110_s19] sm:$0xff]  ;;  %v134_v8 = vld [vmem:[%s110_s19 + $0x8] sm:$0xff] }
  0x36   : > { %204 = vmatpush.xpose.msra.mxu2 %v135_v5  ;;  %227 = vmatpush.xpose.msra.mxu3 %v136_v6  ;;  %v141_v15 = vld [vmem:[#allocation2] sm:$0xff] }
  0x37   : > { %158 = vmatpush.xpose.msra.mxu0 %v133_v7  ;;  %181 = vmatpush.xpose.msra.mxu1 %v134_v8  ;;  %v142_v24 = vld [vmem:[#allocation2 + $0x8] sm:$0xff] }
  0x39   : > { %205 = vmatmul.f32.vlgmr.msra.gmra.mxu2 %v135_v5  ;;  %228 = vmatmul.f32.vlgmr.msra.gmra.mxu3 %v136_v6 }
  0x3a   : > { %159 = vmatmul.f32.vlgmr.msra.gmra.mxu0 %v133_v7  ;;  %182 = vmatmul.f32.vlgmr.msra.gmra.mxu1 %v134_v8 }
  0x41   : > { %208 = vmatmul.f32.gmra.mxu2 %v139_v1  ;;  %231 = vmatmul.f32.gmra.mxu3 %v140_v2 }
  0x42   : > { %162 = vmatmul.f32.gmra.mxu0 %v137_v3  ;;  %185 = vmatmul.f32.gmra.mxu1 %v138_v4 }
  0xb7   : > { %v160_v9 = vpop.f32.mrf.mxu0  ;;  %v183_v10 = vpop.f32.mrf.mxu1 }
  0xb8   : > { %v184_v11 = vadd.f32 %v183_v10, %v160_v9 }
  0xbc   : > { %v206_v12 = vpop.f32.mrf.mxu2  ;;  %v229_v13 = vpop.f32.mrf.mxu3 }
  0xbd   : > { %v207_v14 = vadd.f32 %v206_v12, %v184_v11 }
  0xbf   : > { %v230_v16 = vadd.f32 %v229_v13, %v207_v14  ;;  %v163_v17 = vpop.f32.mrf.mxu0  ;;  %v186_v18 = vpop.f32.mrf.mxu1 }
  0xc0   : > { %v187_v20 = vadd.f32 %v186_v18, %v163_v17 }
  0xc1   : > { %v235_v19 = vadd.f32 %v230_v16, %v141_v15 }
  0xc3   : > { %238 = vst.msk [vmem:[#allocation2] sm:$0xff] %vm237_vm1, %v235_v19 }
  0xc4   : > { %v209_v21 = vpop.f32.mrf.mxu2  ;;  %v232_v22 = vpop.f32.mrf.mxu3 }
  0xc5   : > { %v210_v23 = vadd.f32 %v209_v21, %v187_v20 }
  0xc7   : > { %v233_v25 = vadd.f32 %v232_v22, %v210_v23  ;;  %243 = sbr.rel (%p429_p7) target bundleno = 619 (0x26b), region = 36 }
  0xc9   : > { %v236_v26 = vadd.f32 %v233_v25, %v142_v24 }
  0xcb   : > { %239 = vst.msk [vmem:[#allocation2 + $0x8] sm:$0xff] %vm237_vm1, %v236_v26 }
  0xcc   : > { %v246_v27 = vlaneseq  ;;  %v244_v28 = vld [vmem:[#allocation2] sm:$0xff]  ;;  %v597_v61 = vmov -0.125  }
  0xcd   : > { %v270_v44 = vmul.f32 2.0, %v244_v28 }
  0xce   : > { %v247_v29 = vshrl.u32 %v246_v27, 7  ;;  %v250_v30 = vand.u32 127, %v246_v27 }
  0xd0   : > { %vm251_vm2 = vcmp.eq.s32.totalorder %v247_v29, %v250_v30  ;;  %v248_v32 = vadd.s32 8, %v247_v29  ;;  %vm278_vm4 = vcmp.lt.s32.totalorder %v250_v30, 8 }
  0xd1   : > { %v253_v33 = vsel %vm251_vm2, %v244_v28, 0.0  ;;  %v279_v62 = vsel %vm278_vm4, 0.125, %v597_v61 }
  0xd2   : > { %v245_v31 = vld [vmem:[#allocation2 + $0x8] sm:$0xff]  ;;  %v255_v34 = vsel %vm237_vm1, %v253_v33, 0.0  ;;  %vm252_vm3 = vcmp.eq.s32.totalorder %v248_v32, %v250_v30  ;;  %v280_v2 = vmul.f32 0.125, %v279_v62  ;;  %v281_v5 = vmul.f32 -0.125, %v279_v62 }
  0xd3   : > { %256 = vadd.xlane.f32.xlu0 %v255_v34  ;;  %v254_v35 = vsel %vm252_vm3, %v245_v31, 0.0  ;;  %v271_v50 = vmul.f32 2.0, %v245_v31 }
  0xd4   : > { %v258_v36 = vsel %vm237_vm1, %v254_v35, 0.0 }
  0xd5   : > { %v261_v37 = vadd.f32 %v258_v36, %v255_v34 }
  0xd7   : > { %v262_v38 = vrot.slane %v261_v37, 4 }
  0xd9   : > { %v263_v39 = vadd.f32 %v262_v38, %v261_v37 }
  0xdb   : > { %259 = vadd.xlane.f32.xlu0 %v258_v36  ;;  %v264_v40 = vrot.slane %v263_v39, 2 }
  0xdd   : > { %v265_v41 = vadd.f32 %v264_v40, %v263_v39 }
  0xdf   : > { %v266_v42 = vrot.slane %v265_v41, 1 }
  0xe1   : > { %v267_v43 = vadd.f32 %v266_v42, %v265_v41 }
 0x146   : > { %v257_v45 = vpop.xlane.xlu0 %256 }
 0x147   : > { %v268_v46 = vadd.f32 %v267_v43, %v257_v45 }
 0x149   : > { %v272_v47 = vsub.f32 %v268_v46, %v270_v44 }
 0x14b   : > { %v282_v48 = vmul.f32 -0.5, %v272_v47  ;;  %v303_v49 = vmul.f32 -0.125, %v272_v47  ;;  %v324_v51 = vmul.f32 -0.005, %v272_v47 }
 0x14d   : > { %v284_v53 = vmul.f32 1.442695, %v282_v48  ;;  %v305_v55 = vmul.f32 1.442695, %v303_v49  ;;  %v326_v56 = vmul.f32 1.442695, %v324_v51 }
 0x14e   : > { %v260_v52 = vpop.xlane.xlu0 %259 }
 0x14f   : > { %v269_v54 = vadd.f32 %v267_v43, %v260_v52  ;;  %495 = vpow2.f32 %v284_v53 }
 0x150   : > { %497 = vpow2.f32 %v305_v55 }
 0x151   : > { %v273_v57 = vsub.f32 %v269_v54, %v271_v50  ;;  %499 = vpow2.f32 %v326_v56 }
 0x153   : > { %v283_v58 = vmul.f32 -0.5, %v273_v57  ;;  %v304_v59 = vmul.f32 -0.125, %v273_v57  ;;  %v325_v60 = vmul.f32 -0.005, %v273_v57 }
 0x155   : > { %v286_v63 = vmul.f32 1.442695, %v283_v58  ;;  %v307_v0 = vmul.f32 1.442695, %v304_v59  ;;  %v328_v1 = vmul.f32 1.442695, %v325_v60  ;;  %v496_v3 = vpop.eup %495 }
 0x156   : > { %v498_v4 = vpop.eup %497  ;;  %v288_v7 = vmul.f32 %v496_v3, %v280_v2 }
 0x157   : > { %501 = vpow2.f32 %v286_v63  ;;  %v500_v6 = vpop.eup %499  ;;  %v309_v9 = vmul.f32 %v498_v4, %v280_v2 }
 0x158   : > { %503 = vpow2.f32 %v307_v0  ;;  %v330_v11 = vmul.f32 %v500_v6, %v280_v2  ;;  %v290_v16 = vsel %vm237_vm1, %v288_v7, 0.0 }
 0x159   : > { %505 = vpow2.f32 %v328_v1  ;;  %v311_v19 = vsel %vm237_vm1, %v309_v9, 0.0 }
 0x15a   : > { %v332_v21 = vsel %vm237_vm1, %v330_v11, 0.0 }
 0x15d   : > { %v502_v8 = vpop.eup %501 }
 0x15e   : > { %v504_v10 = vpop.eup %503  ;;  %v289_v12 = vmul.f32 %v502_v8, %v281_v5 }
 0x15f   : > { %v506_v13 = vpop.eup %505  ;;  %v310_v14 = vmul.f32 %v504_v10, %v281_v5 }
 0x160   : > { %v331_v15 = vmul.f32 %v506_v13, %v281_v5  ;;  %v291_v17 = vsel %vm237_vm1, %v289_v12, 0.0 }
 0x161   : > { %v292_v18 = vadd.f32 %v291_v17, %v290_v16  ;;  %v312_v20 = vsel %vm237_vm1, %v310_v14, 0.0 }
 0x162   : > { %v333_v22 = vsel %vm237_vm1, %v331_v15, 0.0  ;;  %v313_v23 = vadd.f32 %v312_v20, %v311_v19 }
 0x163   : > { %v334_v24 = vadd.f32 %v333_v22, %v332_v21  ;;  %293 = vadd.xlane.f32.xlu1 %v292_v18 }
 0x165   : > { %335 = vadd.xlane.f32.xlu2 %v334_v24 }
 0x16b   : > { %314 = vadd.xlane.f32.xlu1 %v313_v23 }
 0x1d6   : > { %v294_v25 = vpop.xlane.xlu1 %293 }
 0x1d7   : > { %v295_v26 = vrot.slane %v294_v25, 4 }
 0x1d8   : > { %v336_v27 = vpop.xlane.xlu2 %335 }
 0x1d9   : > { %v337_v28 = vrot.slane %v336_v27, 4  ;;  %v296_v29 = vadd.f32 %v295_v26, %v294_v25 }
 0x1db   : > { %v338_v30 = vadd.f32 %v337_v28, %v336_v27  ;;  %v297_v31 = vrot.slane %v296_v29, 2 }
 0x1dd   : > { %v298_v32 = vadd.f32 %v297_v31, %v296_v29  ;;  %v339_v33 = vrot.slane %v338_v30, 2 }
 0x1de   : > { %v315_v34 = vpop.xlane.xlu1 %314 }
 0x1df   : > { %v316_v35 = vrot.slane %v315_v34, 4  ;;  %v299_v36 = vrot.slane %v298_v32, 1  ;;  %v340_v39 = vadd.f32 %v339_v33, %v338_v30 }
 0x1e1   : > { %v317_v37 = vadd.f32 %v316_v35, %v315_v34  ;;  %v300_v38 = vadd.f32 %v299_v36, %v298_v32  ;;  %v341_v42 = vrot.slane %v340_v39, 1 }
 0x1e3   : > { %v318_v40 = vrot.slane %v317_v37, 2  ;;  %435 = vpush %v300_v38  ;;  %v342_v45 = vadd.f32 %v341_v42, %v340_v39 }
 0x1e5   : > { %v319_v41 = vadd.f32 %v318_v40, %v317_v37 }
 0x1e7   : > { %v320_v43 = vrot.slane %v319_v41, 1 }
 0x1e9   : > { %v321_v44 = vadd.f32 %v320_v43, %v319_v41 }
 0x1eb   : > { %437 = vpush %v321_v44 }
 0x1ec   : > { %439 = vpush %v342_v45 }
 0x214   : > { %s436_s9 = spop %435 }
 0x21c   : > { %s438_s16 = spop %437 }
 0x21d   : > { %s323_s20 = sadd.f32 %s438_s16, %s436_s9  ;;  %s440_s21 = spop %439 }
 0x21f   : > { %s344_s22 = sadd.f32 %s440_s21, %s323_s20 }
 0x221   : > { %s345_s24 = smax.f32 %s598_s23, %s344_s22 }
 0x222   : > { %v346_v46 = vstv %s345_s24 }
 0x223   : > { %507 = vrsqrt.f32 %v346_v46  ;;  %vm354_vm5 = vcmp.eq.f32.partialorder %v346_v46, inf  ;;  %v357_v54 = vand.u32 2147483648, %v346_v46  ;;  %vm356_vm6 = vcmp.eq.f32.partialorder %v346_v46, 0.0 }
 0x229   : > { %v508_v47 = vpop.eup %507 }
 0x22a   : > { %v348_v48 = vmul.f32 %v508_v47, %v346_v46 }
 0x22c   : > { %v349_v49 = vmul.f32 %v508_v47, %v348_v48 }
 0x22e   : > { %v350_v50 = vmul.f32 0.5, %v349_v49 }
 0x230   : > { %v351_v51 = vsub.f32 1.5, %v350_v50 }
 0x232   : > { %v352_v52 = vmul.f32 %v508_v47, %v351_v51 }
 0x234   : > { %v353_v53 = vmul.f32 %v352_v52, %v346_v46 }
 0x236   : > { %v355_v55 = vsel %vm354_vm5, %v346_v46, %v353_v53 }
 0x237   : > { %v358_v56 = vsel %vm356_vm6, %v357_v54, %v355_v55 }
 0x238   : > { %441 = vpush %v358_v56 }
 0x269   : > { %s442_s25 = spop %441 }
 0x26a   : > { %361 = sst [smem:[#allocation6]] %s442_s25 }
 0x26b PF: > { %p454_p8 = scmp.eq.s32.totalorder %s629_s10, 1  ;;  %s368_s28 = sshll.u32 %s712_s1, 4  ;;  %s369_s28 = int_to_ptr.hbm [resolvable:$true] %s368_s28 }
 0x26c   : > { %s599_s29 = smov [#allocation6]  }
 0x26d   : > { %446 = dma.smem_to_hbm (%p454_p8), %s599_s29, 16, %s369_s28, [#allocation5]  }
 0x26e   : > { %574 = dma.done.wait (%p454_p8), [#allocation5], 16  }
 0x26f   : > { %576 = vsyncadd (%p454_p8), [#allocation5], 4294967280 }
 0x270   : > { %377 = sfence }
 0x271 PF: > { %p12_p9 = scmp.ge.s32.totalorder %s632_s11, 4   ;;  %s716_s6 = smov %s583_s7 }
 0x272   : > { %s717_s7 = smov %s587_s8  ;;  %s718_s8 = smov %s642_s14 }
 0x273   : > { %s719_s9 = smov %s632_s11  ;;  %14 = sbr.rel (!%p12_p9) target bundleno = 4 (0x4), region = 70 }
 0x278   :  { %383 = vsyncpa [#allocation4], 1 }
 0x279   :  { %385 = vsyncpa [#allocation4 + $0x1], 1 }
 0x27a   :  { %386 = vsyncpa [#allocation5], 1 }
 0x27b   :  { %388 = vsyncpa [#allocation5 + $0x1], 1 }

</bundles_post_ra>
